<compile_context>
chip_gen: v7x
topology: tpu7x:2x2x1
jax: 0.10.0
libtpu: 0.0.40
codegen_flags: <defaults>
</compile_context>

<pallas_src>
import math

import jax
import jax.numpy as jnp
from jax.experimental import pallas as pl
from jax.experimental.pallas import tpu as pltpu

_LANE = 128
_SUBLANE = 8
_VMEM_BUDGET = 24 << 20     # target bytes of live double-buffered blocks per grid step
_VMEM_LIMIT = 40 << 20      # scoped VMEM limit for Mosaic (safe on v5e/v6e/v7x)
_MIN_SPLIT_BYTES = 4 << 20  # arrays at least this big get >= 4 grid steps (2-TC sharding)


def _pos_embed_kernel(x_ref, pe_ref, o_ref):
    # x_ref: (B, rows, cols), pe_ref: (1, rows, cols) -> broadcasts over batch. Pure VPU add.
    o_ref[...] = x_ref[...] + pe_ref[...]


def make_sinusoidal_pe(max_seq_length, embed_dim, dtype=jnp.float32):
    """Same table as the PyTorch __init__ (sin on even cols, cos on odd cols).

    Built once at init, already in the model dtype, so the forward pass does no
    per-call casting.  (Like the original, embed_dim must be even.)
    """
    position = jnp.arange(max_seq_length, dtype=jnp.float32)[:, None]          # (L, 1)
    div_term = jnp.exp(jnp.arange(0, embed_dim, 2, dtype=jnp.float32)
                       * (-math.log(10000.0) / embed_dim))                     # (D/2,)
    pe = jnp.zeros((max_seq_length, embed_dim), jnp.float32)
    pe = pe.at[:, 0::2].set(jnp.sin(position * div_term))
    pe = pe.at[:, 1::2].set(jnp.cos(position * div_term))
    return pe.astype(dtype)


def _pallas_add(x_in, pe_in, block, grid):
    """out = x_in + pe_in (pe broadcast over axis 0), tiled along the middle axis."""
    b_blk, r_blk, c_blk = block
    return pl.pallas_call(
        _pos_embed_kernel,
        out_shape=jax.ShapeDtypeStruct(x_in.shape, x_in.dtype),
        grid_spec=pltpu.PrefetchScalarGridSpec(
            num_scalar_prefetch=0,
            grid=grid,
            in_specs=[
                pl.BlockSpec((b_blk, r_blk, c_blk), lambda j: (0, j, 0)),   # x rows
                pl.BlockSpec((1, r_blk, c_blk), lambda j: (0, j, 0)),       # pe rows (bcast over B)
            ],
            out_specs=pl.BlockSpec((b_blk, r_blk, c_blk), lambda j: (0, j, 0)),
        ),
        compiler_params=pltpu.CompilerParams(
            dimension_semantics=("parallel",),
            vmem_limit_bytes=_VMEM_LIMIT,
        ),
        input_output_aliases={0: 0},   # donate x into the output buffer
    )(x_in, pe_in)


def positional_embedding(x, pe):
    """Pallas implementation of PositionalEmbedding.forward.

    x:  [B, S, D] activations
    pe: [max_seq_length, D] precomputed sinusoidal table (S <= max_seq_length)
    returns: [B, S, D]  = x + pe[:S]
    """
    B, S, D = x.shape
    assert pe.shape[1] == D and pe.shape[0] >= S
    if pe.dtype != x.dtype:            # no-op when the table is prebuilt in the model dtype
        pe = pe.astype(x.dtype)

    total = S * D
    dsz = x.dtype.itemsize

    if total % _LANE != 0:
        # --- Fallback: S*D not lane-aligned.  Tile over S with full-D blocks so VMEM
        # stays bounded for long sequences (stores may be masked when D % 128 != 0).
        per_s = (4 * B + 2) * D * dsz
        s_cap = max(_SUBLANE, (_VMEM_BUDGET // per_s) // _SUBLANE * _SUBLANE)
        s_blk = S if S <= s_cap else s_cap
        pe_s = pe[:S].reshape(1, S, D)
        return _pallas_add(x, pe_s, (B, s_blk, D), (pl.cdiv(S, s_blk),))

    # --- Main path: lane-dense (B, R, 128) view of the flattened token*feature axis.
    R = total // _LANE
    x3 = x.reshape(B, R, _LANE)                       # row-major flatten: free

    # Row-block size from the VMEM budget: per step the pipeline holds roughly
    # 2*x + 2*out + 2*pe blocks = (4B + 2) * r_blk * 128 * dsz bytes.
    per_row = (4 * B + 2) * _LANE * dsz
    r_cap = max(_SUBLANE, (_VMEM_BUDGET // per_row) // _SUBLANE * _SUBLANE)
    # Big arrays get >= 4 blocks so the "parallel" axis can shard over 2 TCs (v7x);
    # tiny arrays stay single-block to avoid per-step overhead.
    want_steps = 4 if B * total * dsz >= _MIN_SPLIT_BYTES else 1
    r_want = pl.cdiv(pl.cdiv(R, want_steps), _SUBLANE) * _SUBLANE
    if R <= min(r_cap, r_want):
        r_blk = R                                     # full-extent row block (always legal)
    else:
        r_blk = min(r_cap, r_want)                    # multiple of 8 by construction
    grid = (pl.cdiv(R, r_blk),)

    # Consume the pe table directly (no per-call slice/copy) when BlockSpec rules allow;
    # the first R rows of the flattened table are exactly pe[:S] flattened.
    total_full = pe.shape[0] * D
    if r_blk % _SUBLANE == 0 and total_full % _LANE == 0:
        pe3 = pe.reshape(1, total_full // _LANE, _LANE)
    else:
        pe3 = pe.reshape(-1)[:total].reshape(1, R, _LANE)   # tiny slice, only when needed

    out3 = _pallas_add(x3, pe3, (B, r_blk, _LANE), grid)
    return out3.reshape(B, S, D)


if __name__ == "__main__":
    # Small shapes consistent with the module.
    embed_dim = 32
    max_seq_length = 64
    B, S = 2, 8

    key = jax.random.PRNGKey(0)
    x = jax.random.normal(key, (B, S, embed_dim), jnp.float32)
    pe = make_sinusoidal_pe(max_seq_length, embed_dim, dtype=x.dtype)

    ref = x + pe[:S][None, :, :]                      # pure-JAX reference (computed first)
    out = jax.block_until_ready(positional_embedding(x, pe))
    assert out.shape == (B, S, embed_dim) and out.dtype == jnp.float32
    assert jnp.allclose(out, ref, atol=1e-6, rtol=1e-6)

    # Extra check: larger shape exercising the multi-block (grid > 1) lane-dense path.
    B2, S2, D2 = 8, 1024, 256
    x2 = jax.random.normal(jax.random.PRNGKey(1), (B2, S2, D2), jnp.float32)
    pe2 = make_sinusoidal_pe(S2, D2, dtype=x2.dtype)
    ref2 = x2 + pe2[:S2][None, :, :]
    out2 = jax.block_until_ready(positional_embedding(x2, pe2))
    assert jnp.allclose(out2, ref2, atol=1e-5, rtol=1e-5)

    # Extra check: non-128-aligned S*D exercising the bounded fallback path.
    B3, S3, D3 = 2, 8, 24
    x3 = jax.random.normal(jax.random.PRNGKey(2), (B3, S3, D3), jnp.float32)
    pe3 = make_sinusoidal_pe(16, D3, dtype=x3.dtype)
    ref3 = x3 + pe3[:S3][None, :, :]
    out3 = jax.block_until_ready(positional_embedding(x3, pe3))
    assert jnp.allclose(out3, ref3, atol=1e-6, rtol=1e-6)

    print("KERNEL_OK")
</pallas_src>

<mosaic_0001>
module attributes {stable_mosaic.version = 11 : i64} {
  func.func @_pos_embed_kernel(%arg0: i32, %arg1: memref<2x2x128xf32, #tpu.memory_space<vmem>>, %arg2: memref<1x2x128xf32, #tpu.memory_space<vmem>>, %arg3: memref<2x2x128xf32, #tpu.memory_space<vmem>>) attributes {dimension_semantics = [#tpu.dimension_semantics<parallel>], iteration_bounds = array<i64: 1>, scalar_prefetch = 0 : i64, scratch_operands = 0 : i64, tpu.core_type = #tpu.core_type<tc>, window_params = [{transform_indices = @transform_0, window_bounds = array<i64: 2, 2, 128>}, {transform_indices = @transform_1, window_bounds = array<i64: 1, 2, 128>}, {transform_indices = @transform_2, window_bounds = array<i64: 2, 2, 128>}]} {
    %c0 = arith.constant 0 : index
    %c0_0 = arith.constant 0 : index
    %c0_1 = arith.constant 0 : index
    %0 = vector.load %arg1[%c0, %c0_0, %c0_1] : memref<2x2x128xf32, #tpu.memory_space<vmem>>, vector<2x2x128xf32>
    %c0_2 = arith.constant 0 : index
    %c0_3 = arith.constant 0 : index
    %c0_4 = arith.constant 0 : index
    %1 = vector.load %arg2[%c0_2, %c0_3, %c0_4] : memref<1x2x128xf32, #tpu.memory_space<vmem>>, vector<1x2x128xf32>
    %2 = vector.broadcast %1 : vector<1x2x128xf32> to vector<2x2x128xf32>
    %3 = arith.addf %0, %2 : vector<2x2x128xf32>
    %c0_5 = arith.constant 0 : index
    %c0_6 = arith.constant 0 : index
    %c0_7 = arith.constant 0 : index
    %4 = vector.load %arg3[%c0_5, %c0_6, %c0_7] : memref<2x2x128xf32, #tpu.memory_space<vmem>>, vector<2x2x128xf32>
    tpu.vector_store %arg3[%c0_5, %c0_6, %c0_7], %3 {strides = array<i32>} : memref<2x2x128xf32, #tpu.memory_space<vmem>>, vector<2x2x128xf32>,
    return
  }
  func.func @transform_0(%arg0: i32) -> (i32, i32, i32) {
    %c0_i32 = arith.constant 0 : i32
    %c0_i32_0 = arith.constant 0 : i32
    %c0_i32_1 = arith.constant 0 : i32
    return %c0_i32, %arg0, %c0_i32_0 : i32, i32, i32
  }
  func.func @transform_1(%arg0: i32) -> (i32, i32, i32) {
    %c0_i32 = arith.constant 0 : i32
    %c0_i32_0 = arith.constant 0 : i32
    %c0_i32_1 = arith.constant 0 : i32
    return %c0_i32, %arg0, %c0_i32_0 : i32, i32, i32
  }
  func.func @transform_2(%arg0: i32) -> (i32, i32, i32) {
    %c0_i32 = arith.constant 0 : i32
    %c0_i32_0 = arith.constant 0 : i32
    %c0_i32_1 = arith.constant 0 : i32
    return %c0_i32, %arg0, %c0_i32_0 : i32, i32, i32
  }
}

</mosaic_0001>

<bundles_post_ra>
// kernel: tpu_custom_call.1
= control target key start
LH: loop header
LB: loop body
LE: loop exit
PB: predicated region body
PF: predicated region fallthrough
CT: control target
= control target key end

     0   :  { %7 = vsyncpa [#allocation3], 0  ;;  %s154_s0 = inlined_call_operand.hbm [shape: f32[2,2,128], index: 0, kind: input, shape index: {}, may-alias: {0,2}]   ;;  %s155_s1 = inlined_call_operand.vmem [shape: f32[1,2,128], index: 1, kind: input, shape index: {}]   ;;  %s156_s2 = inlined_call_operand.hbm [shape: f32[2,2,128], index: 2, kind: output, shape index: {}, may-alias: {0,2}]  }
   0x1   :  { %8 = vsyncpa [#allocation4], 0  ;;  %s102_s9 = smov [#allocation2]   ;;  %s54_s13 = scalar_lea.hbm %s154_s0, 64 }
   0x2   :  { %s14_s10 = sshll.u32 %s102_s9, 4  ;;  %p55_p0 = scmp.ne.s32.totalorder %s154_s0, %s54_s13  ;;  %s15_s10 = int_to_ptr.vmem [resolvable:$true] %s14_s10 }
   0x3   :  { %p58_p1 = scmp.lt.u32.totalorder %s54_s13, %s154_s0 }
   0x5   :  { %p60_p2 = pnand %p58_p1, %p55_p0 }
   0x7   :  { %63 = shalt.err (!%p60_p2)
}
   0x8   :  { %s64_s18 = scalar_lea.vmem %s15_s10, 64  ;;  %p69_p4 = scmp.lt.s32.totalorder %s15_s10, %s15_s10 }
   0x9   :  { %p65_p3 = scmp.ne.s32.totalorder %s15_s10, %s64_s18  ;;  %p70_p5 = scmp.lt.s32.totalorder %s64_s18, %s64_s18 }
   0xb   :  { %p71_p6 = por %p70_p5, %p69_p4 }
   0xd   :  { %p72_p7 = pnand %p71_p6, %p65_p3 }
   0xf   :  { %75 = shalt.err (!%p72_p7)
}
  0x10   :  { %s103_s19 = smov 32   ;;  %s104_s20 = smov 2  }
  0x11   :  { %20 = dma.hbm_to_vmem [thread:$0]  %s154_s0, 64, %s15_s10, [#allocation3], %s103_s19, %s103_s19, %s104_s20  }
  0x12   :  { %98 = dma.done.wait [#allocation3], 64  }
  0x13   :  { %99 = vsyncadd [#allocation3], 4294967232  ;;  %s105_s23 = smov [#allocation5]   ;;  %v26_v0 = vld [vmem:[#allocation2] sm:$0x3] }
  0x14   :  { %s38_s24 = sshll.u32 %s105_s23, 4  ;;  %v28_v1 = vld [vmem:[%s155_s1] sm:$0x3]  ;;  %v27_v2 = vld [vmem:[#allocation2 + $0x2] sm:$0x3]  ;;  %s39_s24 = int_to_ptr.vmem [resolvable:$true] %s38_s24 }
  0x15   :  { %v29_v3 = vadd.f32 %v28_v1, %v26_v0  ;;  %v30_v4 = vadd.f32 %v28_v1, %v27_v2  ;;  %s76_s27 = scalar_lea.vmem %s39_s24, 64  ;;  %p81_p9 = scmp.lt.s32.totalorder %s39_s24, %s39_s24 }
  0x16   :  { %p77_p8 = scmp.ne.s32.totalorder %s39_s24, %s76_s27  ;;  %p82_p10 = scmp.lt.s32.totalorder %s76_s27, %s76_s27 }
  0x17   :  { %31 = vst [vmem:[#allocation5] sm:$0x3] %v29_v3  ;;  %32 = vst [vmem:[#allocation5 + $0x2] sm:$0x3] %v30_v4 }
  0x18   :  { %p83_p11 = por %p82_p10, %p81_p9 }
  0x1a   :  { %p84_p12 = pnand %p83_p11, %p77_p8 }
  0x1c   :  { %87 = shalt.err (!%p84_p12)
}
  0x1d   :  { %s88_s29 = scalar_lea.hbm %s156_s2, 64 }
  0x1e   :  { %p89_p13 = scmp.ne.s32.totalorder %s156_s2, %s88_s29  ;;  %p92_p0 = scmp.lt.u32.totalorder %s88_s29, %s156_s2 }
  0x20   :  { %p94_p1 = pnand %p92_p0, %p89_p13 }
  0x22   :  { %97 = shalt.err (!%p94_p1)
}
  0x23   :  { %44 = dma.vmem_to_hbm [thread:$0]  %s39_s24, 64, %s156_s2, [#allocation4], %s103_s19, %s103_s19, %s104_s20  }
  0x24   :  { %100 = dma.done.wait [#allocation4], 64  }
  0x25   :  { %101 = vsyncadd [#allocation4], 4294967232 }
  0x26   :  { %48 = vsyncpa [#allocation3], 1 }
  0x27   :  { %49 = vsyncpa [#allocation4], 1 }

</bundles_post_ra>
